<compile_context>
chip_gen: v7x
topology: tpu7x:2x2x1
jax: 0.10.0
libtpu: 0.0.40
codegen_flags: <defaults>
</compile_context>

<pallas_src>
import functools

import jax
import jax.numpy as jnp
from jax.experimental import pallas as pl
from jax.experimental.pallas import tpu as pltpu

_EPS = 1e-5
_INV_SQRT2 = 0.7071067811865476


def _layernorm(x, w, b):
    """Two-pass LayerNorm over the last axis.  w, b broadcast as (1, D)."""
    mu = jnp.mean(x, axis=-1, keepdims=True)
    xc = x - mu
    var = jnp.mean(xc * xc, axis=-1, keepdims=True)
    return xc * jax.lax.rsqrt(var + _EPS) * w + b


def _mixer_stack_kernel(x_ref, convw_ref, convb_ref,
                        ln1w_ref, ln1b_ref, ln2w_ref, ln2b_ref,
                        w1_ref, b1_ref, w2_ref, b2_ref,
                        o_ref):
    layer = pl.program_id(1)
    mm_dtype = convw_ref.dtype            # weights already pre-cast in the wrapper

    # Initialize the resident output block (the depth-sweep carry) at layer 0.
    @pl.when(layer == 0)
    def _():
        o_ref[...] = x_ref[...]

    x = o_ref[...]                        # (T, Bb, D) float32 carry
    t, bb, d = x.shape

    # ---- seq_layernorm ----
    xn = _layernorm(x, ln1w_ref[0], ln1b_ref[0])

    # ---- causal token-mixing "conv": tril(W)[T,T] @ xn[T, Bb*D] (one matmul) ----
    y = jnp.dot(convw_ref[0], xn.reshape(t, bb * d).astype(mm_dtype),
                preferred_element_type=jnp.float32)
    y = y + convb_ref[0]                  # (T, 1) bias broadcasts over Bb*D columns
    x = y.reshape(t, bb, d) + x           # residual

    # ---- patch_layernorm ----
    xn2 = _layernorm(x, ln2w_ref[0], ln2b_ref[0])

    # ---- patch feed-forward: Linear -> exact GELU -> Linear (M = T*Bb) ----
    xf = xn2.reshape(t * bb, d).astype(mm_dtype)
    h = jnp.dot(xf, w1_ref[0], preferred_element_type=jnp.float32) + b1_ref[0]
    h = 0.5 * h * (1.0 + jax.lax.erf(h * _INV_SQRT2))     # nn.GELU() (erf form)
    out = jnp.dot(h.astype(mm_dtype), w2_ref[0],
                  preferred_element_type=jnp.float32) + b2_ref[0]

    o_ref[...] = out.reshape(t, bb, d) + x                # residual; carried to next layer


def _pick_batch_block(batch, max_block=8):
    for cand in range(min(batch, max_block), 0, -1):
        if batch % cand == 0:
            return cand
    return 1


def mixer_blocks(x_tbd, p, *, b_block=None, matmul_dtype=jnp.bfloat16,
                 core_parallel=False):
    """Run all `depth` MixerBlocks in one fused pallas_call.

    x_tbd: (T, B, D) float32 activations (sequence-major layout).
    p: dict of depth-stacked params; p["conv_w_masked"] is tril(conv_w).
    """
    T, B, D = x_tbd.shape
    depth = p["conv_w_masked"].shape[0]
    I = p["w1"].shape[-1]

    if b_block is None:
        b_block = _pick_batch_block(B)
    assert B % b_block == 0
    n_b = B // b_block

    # Pre-cast the matmul weights (bf16 by default); biases / LN params stay f32
    # and are added on the f32 accumulator side.
    conv_w = p["conv_w_masked"].astype(matmul_dtype)
    w1 = p["w1"].astype(matmul_dtype)
    w2 = p["w2"].astype(matmul_dtype)

    # One layer's slice of each stacked weight, indexed by the depth coordinate.
    def wspec(shape):
        return pl.BlockSpec(shape, lambda b, l: (l, 0, 0))

    # VMEM budget: double-buffered weights + in/out activation blocks + FF hidden.
    w_isz = jnp.dtype(matmul_dtype).itemsize
    w_layer_bytes = (T * T + 2 * D * I) * w_isz + (T + 5 * D + I) * 4
    act_bytes = b_block * T * D * 4
    inter_bytes = b_block * T * I * 4
    vmem_needed = 2 * w_layer_bytes + 4 * act_bytes + 2 * inter_bytes
    vmem_limit = int(min(max(2 * vmem_needed, 32 * 2**20), 100 * 2**20))

    cost = pl.CostEstimate(
        flops=int(depth * B * (2 * T * T * D + 4 * T * D * I)),
        transcendentals=int(depth * B * T * I),
        bytes_accessed=int(2 * B * T * D * 4 + n_b * depth * w_layer_bytes),
    )

    # On v7x, pass core_parallel=True to shard the batch axis across the 2 TCs.
    sem0 = pltpu.CORE_PARALLEL if core_parallel else "parallel"

    return pl.pallas_call(
        _mixer_stack_kernel,
        out_shape=jax.ShapeDtypeStruct((T, B, D), x_tbd.dtype),
        grid_spec=pltpu.PrefetchScalarGridSpec(
            num_scalar_prefetch=0,
            grid=(n_b, depth),                                   # depth innermost (carried)
            in_specs=[
                pl.BlockSpec((T, b_block, D), lambda b, l: (0, b, 0)),   # x
                wspec((1, T, T)),                                # masked conv weight
                wspec((1, T, 1)),                                # conv bias
                wspec((1, 1, D)), wspec((1, 1, D)),              # seq_layernorm w, b
                wspec((1, 1, D)), wspec((1, 1, D)),              # patch_layernorm w, b
                wspec((1, D, I)), wspec((1, 1, I)),              # ff linear1 (in,out), bias
                wspec((1, I, D)), wspec((1, 1, D)),              # ff linear2 (in,out), bias
            ],
            out_specs=pl.BlockSpec((T, b_block, D), lambda b, l: (0, b, 0)),
        ),
        compiler_params=pltpu.CompilerParams(
            dimension_semantics=(sem0, "arbitrary"),
            vmem_limit_bytes=vmem_limit),
        cost_estimate=cost,
    )(x_tbd, conv_w, p["conv_b"],
      p["ln1_w"], p["ln1_b"], p["ln2_w"], p["ln2_b"],
      w1, p["b1"], w2, p["b2"])


def init_params(key, n_vocab, dim, depth, length, expansion=4):
    """Deterministic synthetic params, depth-stacked, matching the PyTorch module's shapes."""
    inner = dim * expansion
    keys = jax.random.split(key, 5)
    return {
        "wte": jax.random.normal(keys[0], (n_vocab, dim), jnp.float32) * 0.02,
        # nn.Conv1d(length, length, 1): weight (T, T, 1) -> squeezed to (T, T), stacked over depth
        "conv_w": jax.random.normal(keys[1], (depth, length, length), jnp.float32) * 0.02,
        "conv_b": jax.random.normal(keys[2], (depth, length, 1), jnp.float32) * 0.02,
        # LayerNorm affine params (PyTorch default init: ones / zeros)
        "ln1_w": jnp.ones((depth, 1, dim), jnp.float32),
        "ln1_b": jnp.zeros((depth, 1, dim), jnp.float32),
        "ln2_w": jnp.ones((depth, 1, dim), jnp.float32),
        "ln2_b": jnp.zeros((depth, 1, dim), jnp.float32),
        # nn.Linear(dim, inner): torch weight (inner, dim) stored transposed (dim, inner)
        "w1": jax.random.normal(keys[3], (depth, dim, inner), jnp.float32) * 0.02,
        "b1": jnp.zeros((depth, 1, inner), jnp.float32),
        # nn.Linear(inner, dim): torch weight (dim, inner) stored transposed (inner, dim)
        "w2": jax.random.normal(keys[4], (depth, inner, dim), jnp.float32) * 0.02,
        "b2": jnp.zeros((depth, 1, dim), jnp.float32),
    }


@functools.partial(jax.jit, static_argnames=("matmul_dtype",))
def language_mixer_forward(input_ids, params, matmul_dtype=jnp.bfloat16):
    # Embedding gather stays in plain JAX (lm_head / loss are not applied in forward).
    x = jnp.take(params["wte"], input_ids, axis=0)               # (B, T, D)
    x = jnp.transpose(x, (1, 0, 2))                              # (T, B, D): conv = one (T,T)@(T,B*D) matmul
    p = dict(params)
    p["conv_w_masked"] = jnp.tril(params["conv_w"])              # hoist causal mask out of kernel
    out = mixer_blocks(x, p, matmul_dtype=matmul_dtype)          # (T, B, D)
    return jnp.transpose(out, (1, 0, 2))                         # back to (B, T, D)


def _reference_forward(input_ids, params):
    """Pure-JAX reference (matches the PyTorch forward) for a sanity check."""
    x = jnp.take(params["wte"], input_ids, axis=0)
    depth = params["conv_w"].shape[0]
    for l in range(depth):
        w = jnp.tril(params["conv_w"][l])
        res = x
        mu = jnp.mean(x, -1, keepdims=True)
        var = jnp.mean((x - mu) ** 2, -1, keepdims=True)
        xn = (x - mu) / jnp.sqrt(var + _EPS) * params["ln1_w"][l] + params["ln1_b"][l]
        x = jnp.einsum('ts,bsd->btd', w, xn) + params["conv_b"][l] + res
        res = x
        mu = jnp.mean(x, -1, keepdims=True)
        var = jnp.mean((x - mu) ** 2, -1, keepdims=True)
        xn = (x - mu) / jnp.sqrt(var + _EPS) * params["ln2_w"][l] + params["ln2_b"][l]
        h = xn @ params["w1"][l] + params["b1"][l]
        h = 0.5 * h * (1.0 + jax.lax.erf(h * _INV_SQRT2))
        x = h @ params["w2"][l] + params["b2"][l] + res
    return x


if __name__ == "__main__":
    n_vocab, dim, depth = 64, 32, 2
    batch, seq = 2, 8                                            # tokenized_length = 8

    key = jax.random.PRNGKey(0)
    k_ids, k_params = jax.random.split(key)
    input_ids = jax.random.randint(k_ids, (batch, seq), 0, n_vocab, dtype=jnp.int32)
    params = init_params(k_params, n_vocab, dim, depth, seq)

    ref = _reference_forward(input_ids, params)

    # Exact-parity check: f32 matmul path against the f32 reference.
    out_f32 = language_mixer_forward(input_ids, params, matmul_dtype=jnp.float32)
    jax.block_until_ready(out_f32)
    assert out_f32.shape == (batch, seq, dim) and out_f32.dtype == jnp.float32
    err = float(jnp.max(jnp.abs(out_f32 - ref)))
    assert err < 1e-4, f"f32 path mismatch vs reference: {err}"

    # Default perf path: bf16 matmul inputs, f32 accumulation -> relative check.
    out_bf16 = language_mixer_forward(input_ids, params)
    jax.block_until_ready(out_bf16)
    assert out_bf16.shape == (batch, seq, dim) and out_bf16.dtype == jnp.float32
    rel = float(jnp.max(jnp.abs(out_bf16 - ref)) / (jnp.max(jnp.abs(ref)) + 1e-9))
    assert rel < 5e-2, f"bf16 path relative error too high: {rel}"

    print("KERNEL_OK")
</pallas_src>

<mosaic_0001>
module attributes {stable_mosaic.version = 11 : i64} {
  func.func @_mixer_stack_kernel(%arg0: i32, %arg1: i32, %arg2: memref<8x2x32xf32, #tpu.memory_space<vmem>>, %arg3: memref<1x8x8xf32, #tpu.memory_space<vmem>>, %arg4: memref<1x8x1xf32, #tpu.memory_space<vmem>>, %arg5: memref<1x1x32xf32, #tpu.memory_space<vmem>>, %arg6: memref<1x1x32xf32, #tpu.memory_space<vmem>>, %arg7: memref<1x1x32xf32, #tpu.memory_space<vmem>>, %arg8: memref<1x1x32xf32, #tpu.memory_space<vmem>>, %arg9: memref<1x32x128xf32, #tpu.memory_space<vmem>>, %arg10: memref<1x1x128xf32, #tpu.memory_space<vmem>>, %arg11: memref<1x128x32xf32, #tpu.memory_space<vmem>>, %arg12: memref<1x1x32xf32, #tpu.memory_space<vmem>>, %arg13: memref<8x2x32xf32, #tpu.memory_space<vmem>>) attributes {dimension_semantics = [#tpu.dimension_semantics<parallel>, #tpu.dimension_semantics<arbitrary>], iteration_bounds = array<i64: 1, 2>, scalar_prefetch = 0 : i64, scratch_operands = 0 : i64, tpu.core_type = #tpu.core_type<tc>, window_params = [{transform_indices = @transform_0, window_bounds = array<i64: 8, 2, 32>}, {transform_indices = @transform_1, window_bounds = array<i64: 1, 8, 8>}, {transform_indices = @transform_2, window_bounds = array<i64: 1, 8, 1>}, {transform_indices = @transform_3, window_bounds = array<i64: 1, 1, 32>}, {transform_indices = @transform_4, window_bounds = array<i64: 1, 1, 32>}, {transform_indices = @transform_5, window_bounds = array<i64: 1, 1, 32>}, {transform_indices = @transform_6, window_bounds = array<i64: 1, 1, 32>}, {transform_indices = @transform_7, window_bounds = array<i64: 1, 32, 128>}, {transform_indices = @transform_8, window_bounds = array<i64: 1, 1, 128>}, {transform_indices = @transform_9, window_bounds = array<i64: 1, 128, 32>}, {transform_indices = @transform_10, window_bounds = array<i64: 1, 1, 32>}, {transform_indices = @transform_11, window_bounds = array<i64: 8, 2, 32>}]} {
    %c0_i32 = arith.constant 0 : i32
    %0 = arith.cmpi eq, %arg1, %c0_i32 : i32
    %1 = arith.extui %0 : i1 to i32
    %c0_i32_0 = arith.constant 0 : i32
    %2 = arith.cmpi ne, %1, %c0_i32_0 : i32
    scf.if %2 {
      %c0_51 = arith.constant 0 : index
      %c0_52 = arith.constant 0 : index
      %c0_53 = arith.constant 0 : index
      %92 = vector.load %arg2[%c0_51, %c0_52, %c0_53] : memref<8x2x32xf32, #tpu.memory_space<vmem>>, vector<8x2x32xf32>
      %c0_54 = arith.constant 0 : index
      %c0_55 = arith.constant 0 : index
      %c0_56 = arith.constant 0 : index
      %93 = vector.load %arg13[%c0_54, %c0_55, %c0_56] : memref<8x2x32xf32, #tpu.memory_space<vmem>>, vector<8x2x32xf32>
      tpu.vector_store %arg13[%c0_54, %c0_55, %c0_56], %92 {strides = array<i32>} : memref<8x2x32xf32, #tpu.memory_space<vmem>>, vector<8x2x32xf32>,
    } else {
    }
    %c0 = arith.constant 0 : index
    %c0_1 = arith.constant 0 : index
    %c0_2 = arith.constant 0 : index
    %3 = vector.load %arg13[%c0, %c0_1, %c0_2] : memref<8x2x32xf32, #tpu.memory_space<vmem>>, vector<8x2x32xf32>
    %c0_3 = arith.constant 0 : index
    %c0_4 = arith.constant 0 : index
    %c0_5 = arith.constant 0 : index
    %4 = vector.load %arg5[%c0_3, %c0_4, %c0_5] : memref<1x1x32xf32, #tpu.memory_space<vmem>>, vector<1x1x32xf32>
    %5 = vector.shape_cast %4 : vector<1x1x32xf32> to vector<1x32xf32>
    %c0_6 = arith.constant 0 : index
    %c0_7 = arith.constant 0 : index
    %c0_8 = arith.constant 0 : index
    %6 = vector.load %arg6[%c0_6, %c0_7, %c0_8] : memref<1x1x32xf32, #tpu.memory_space<vmem>>, vector<1x1x32xf32>
    %7 = vector.shape_cast %6 : vector<1x1x32xf32> to vector<1x32xf32>
    %cst = arith.constant dense<0.000000e+00> : vector<8x2xf32>
    %8 = vector.multi_reduction <add>, %3, %cst [2] : vector<8x2x32xf32> to vector<8x2xf32>
    %9 = vector.shape_cast %8 : vector<8x2xf32> to vector<8x2x1xf32>
    %cst_9 = arith.constant 3.200000e+01 : f32
    %10 = vector.broadcast %cst_9 : f32 to vector<8x2x1xf32>
    %11 = arith.divf %9, %10 : vector<8x2x1xf32>
    %12 = vector.broadcast %11 : vector<8x2x1xf32> to vector<8x2x32xf32>
    %13 = arith.subf %3, %12 : vector<8x2x32xf32>
    %14 = arith.mulf %13, %13 : vector<8x2x32xf32>
    %cst_10 = arith.constant dense<0.000000e+00> : vector<8x2xf32>
    %15 = vector.multi_reduction <add>, %14, %cst_10 [2] : vector<8x2x32xf32> to vector<8x2xf32>
    %16 = vector.shape_cast %15 : vector<8x2xf32> to vector<8x2x1xf32>
    %cst_11 = arith.constant 3.200000e+01 : f32
    %17 = vector.broadcast %cst_11 : f32 to vector<8x2x1xf32>
    %18 = arith.divf %16, %17 : vector<8x2x1xf32>
    %cst_12 = arith.constant 9.99999974E-6 : f32
    %19 = vector.broadcast %cst_12 : f32 to vector<8x2x1xf32>
    %20 = arith.addf %18, %19 : vector<8x2x1xf32>
    %21 = math.rsqrt %20 : vector<8x2x1xf32>
    %22 = vector.broadcast %21 : vector<8x2x1xf32> to vector<8x2x32xf32>
    %23 = arith.mulf %13, %22 : vector<8x2x32xf32>
    %24 = vector.shape_cast %5 : vector<1x32xf32> to vector<1x1x32xf32>
    %25 = vector.broadcast %24 : vector<1x1x32xf32> to vector<8x2x32xf32>
    %26 = arith.mulf %23, %25 : vector<8x2x32xf32>
    %27 = vector.shape_cast %7 : vector<1x32xf32> to vector<1x1x32xf32>
    %28 = vector.broadcast %27 : vector<1x1x32xf32> to vector<8x2x32xf32>
    %29 = arith.addf %26, %28 : vector<8x2x32xf32>
    %c0_13 = arith.constant 0 : index
    %c0_14 = arith.constant 0 : index
    %c0_15 = arith.constant 0 : index
    %30 = vector.load %arg3[%c0_13, %c0_14, %c0_15] : memref<1x8x8xf32, #tpu.memory_space<vmem>>, vector<1x8x8xf32>
    %31 = vector.shape_cast %30 : vector<1x8x8xf32> to vector<8x8xf32>
    %32 = vector.shape_cast %29 : vector<8x2x32xf32> to vector<8x64xf32>
    %cst_16 = arith.constant dense<0.000000e+00> : vector<8x64xf32>
    %33 = tpu.matmul %31, %32, %cst_16 {dimension_numbers = #tpu.dot_dimension_numbers<[1], [0], [0], [1], [0, 0, 1, 1], [], []>} : vector<8x8xf32>, vector<8x64xf32>, vector<8x64xf32> -> vector<8x64xf32>
    %c0_17 = arith.constant 0 : index
    %c0_18 = arith.constant 0 : index
    %c0_19 = arith.constant 0 : index
    %34 = vector.load %arg4[%c0_17, %c0_18, %c0_19] : memref<1x8x1xf32, #tpu.memory_space<vmem>>, vector<1x8x1xf32>
    %35 = vector.shape_cast %34 : vector<1x8x1xf32> to vector<8x1xf32>
    %36 = vector.broadcast %35 : vector<8x1xf32> to vector<8x64xf32>
    %37 = arith.addf %33, %36 : vector<8x64xf32>
    %38 = vector.shape_cast %37 : vector<8x64xf32> to vector<8x2x32xf32>
    %39 = arith.addf %38, %3 : vector<8x2x32xf32>
    %c0_20 = arith.constant 0 : index
    %c0_21 = arith.constant 0 : index
    %c0_22 = arith.constant 0 : index
    %40 = vector.load %arg7[%c0_20, %c0_21, %c0_22] : memref<1x1x32xf32, #tpu.memory_space<vmem>>, vector<1x1x32xf32>
    %41 = vector.shape_cast %40 : vector<1x1x32xf32> to vector<1x32xf32>
    %c0_23 = arith.constant 0 : index
    %c0_24 = arith.constant 0 : index
    %c0_25 = arith.constant 0 : index
    %42 = vector.load %arg8[%c0_23, %c0_24, %c0_25] : memref<1x1x32xf32, #tpu.memory_space<vmem>>, vector<1x1x32xf32>
    %43 = vector.shape_cast %42 : vector<1x1x32xf32> to vector<1x32xf32>
    %cst_26 = arith.constant dense<0.000000e+00> : vector<8x2xf32>
    %44 = vector.multi_reduction <add>, %39, %cst_26 [2] : vector<8x2x32xf32> to vector<8x2xf32>
    %45 = vector.shape_cast %44 : vector<8x2xf32> to vector<8x2x1xf32>
    %cst_27 = arith.constant 3.200000e+01 : f32
    %46 = vector.broadcast %cst_27 : f32 to vector<8x2x1xf32>
    %47 = arith.divf %45, %46 : vector<8x2x1xf32>
    %48 = vector.broadcast %47 : vector<8x2x1xf32> to vector<8x2x32xf32>
    %49 = arith.subf %39, %48 : vector<8x2x32xf32>
    %50 = arith.mulf %49, %49 : vector<8x2x32xf32>
    %cst_28 = arith.constant dense<0.000000e+00> : vector<8x2xf32>
    %51 = vector.multi_reduction <add>, %50, %cst_28 [2] : vector<8x2x32xf32> to vector<8x2xf32>
    %52 = vector.shape_cast %51 : vector<8x2xf32> to vector<8x2x1xf32>
    %cst_29 = arith.constant 3.200000e+01 : f32
    %53 = vector.broadcast %cst_29 : f32 to vector<8x2x1xf32>
    %54 = arith.divf %52, %53 : vector<8x2x1xf32>
    %cst_30 = arith.constant 9.99999974E-6 : f32
    %55 = vector.broadcast %cst_30 : f32 to vector<8x2x1xf32>
    %56 = arith.addf %54, %55 : vector<8x2x1xf32>
    %57 = math.rsqrt %56 : vector<8x2x1xf32>
    %58 = vector.broadcast %57 : vector<8x2x1xf32> to vector<8x2x32xf32>
    %59 = arith.mulf %49, %58 : vector<8x2x32xf32>
    %60 = vector.shape_cast %41 : vector<1x32xf32> to vector<1x1x32xf32>
    %61 = vector.broadcast %60 : vector<1x1x32xf32> to vector<8x2x32xf32>
    %62 = arith.mulf %59, %61 : vector<8x2x32xf32>
    %63 = vector.shape_cast %43 : vector<1x32xf32> to vector<1x1x32xf32>
    %64 = vector.broadcast %63 : vector<1x1x32xf32> to vector<8x2x32xf32>
    %65 = arith.addf %62, %64 : vector<8x2x32xf32>
    %66 = vector.shape_cast %65 : vector<8x2x32xf32> to vector<16x32xf32>
    %c0_31 = arith.constant 0 : index
    %c0_32 = arith.constant 0 : index
    %c0_33 = arith.constant 0 : index
    %67 = vector.load %arg9[%c0_31, %c0_32, %c0_33] : memref<1x32x128xf32, #tpu.memory_space<vmem>>, vector<1x32x128xf32>
    %68 = vector.shape_cast %67 : vector<1x32x128xf32> to vector<32x128xf32>
    %cst_34 = arith.constant dense<0.000000e+00> : vector<16x128xf32>
    %69 = tpu.matmul %66, %68, %cst_34 {dimension_numbers = #tpu.dot_dimension_numbers<[1], [0], [0], [1], [0, 0, 1, 1], [], []>} : vector<16x32xf32>, vector<32x128xf32>, vector<16x128xf32> -> vector<16x128xf32>
    %c0_35 = arith.constant 0 : index
    %c0_36 = arith.constant 0 : index
    %c0_37 = arith.constant 0 : index
    %70 = vector.load %arg10[%c0_35, %c0_36, %c0_37] : memref<1x1x128xf32, #tpu.memory_space<vmem>>, vector<1x1x128xf32>
    %71 = vector.shape_cast %70 : vector<1x1x128xf32> to vector<1x128xf32>
    %72 = vector.broadcast %71 : vector<1x128xf32> to vector<16x128xf32>
    %73 = arith.addf %69, %72 : vector<16x128xf32>
    %cst_38 = arith.constant 5.000000e-01 : f32
    %74 = vector.broadcast %cst_38 : f32 to vector<16x128xf32>
    %75 = arith.mulf %74, %73 : vector<16x128xf32>
    %cst_39 = arith.constant 0.707106769 : f32
    %76 = vector.broadcast %cst_39 : f32 to vector<16x128xf32>
    %77 = arith.mulf %73, %76 : vector<16x128xf32>
    %78 = math.erf %77 : vector<16x128xf32>
    %cst_40 = arith.constant 1.000000e+00 : f32
    %79 = vector.broadcast %cst_40 : f32 to vector<16x128xf32>
    %80 = arith.addf %79, %78 : vector<16x128xf32>
    %81 = arith.mulf %75, %80 : vector<16x128xf32>
    %c0_41 = arith.constant 0 : index
    %c0_42 = arith.constant 0 : index
    %c0_43 = arith.constant 0 : index
    %82 = vector.load %arg11[%c0_41, %c0_42, %c0_43] : memref<1x128x32xf32, #tpu.memory_space<vmem>>, vector<1x128x32xf32>
    %83 = vector.shape_cast %82 : vector<1x128x32xf32> to vector<128x32xf32>
    %cst_44 = arith.constant dense<0.000000e+00> : vector<16x32xf32>
    %84 = tpu.matmul %81, %83, %cst_44 {dimension_numbers = #tpu.dot_dimension_numbers<[1], [0], [0], [1], [0, 0, 1, 1], [], []>} : vector<16x128xf32>, vector<128x32xf32>, vector<16x32xf32> -> vector<16x32xf32>
    %c0_45 = arith.constant 0 : index
    %c0_46 = arith.constant 0 : index
    %c0_47 = arith.constant 0 : index
    %85 = vector.load %arg12[%c0_45, %c0_46, %c0_47] : memref<1x1x32xf32, #tpu.memory_space<vmem>>, vector<1x1x32xf32>
    %86 = vector.shape_cast %85 : vector<1x1x32xf32> to vector<1x32xf32>
    %87 = vector.broadcast %86 : vector<1x32xf32> to vector<16x32xf32>
    %88 = arith.addf %84, %87 : vector<16x32xf32>
    %89 = vector.shape_cast %88 : vector<16x32xf32> to vector<8x2x32xf32>
    %90 = arith.addf %89, %39 : vector<8x2x32xf32>
    %c0_48 = arith.constant 0 : index
    %c0_49 = arith.constant 0 : index
    %c0_50 = arith.constant 0 : index
    %91 = vector.load %arg13[%c0_48, %c0_49, %c0_50] : memref<8x2x32xf32, #tpu.memory_space<vmem>>, vector<8x2x32xf32>
    tpu.vector_store %arg13[%c0_48, %c0_49, %c0_50], %90 {strides = array<i32>} : memref<8x2x32xf32, #tpu.memory_space<vmem>>, vector<8x2x32xf32>,
    return
  }
  func.func @transform_0(%arg0: i32, %arg1: i32) -> (i32, i32, i32) {
    %c0_i32 = arith.constant 0 : i32
    %c0_i32_0 = arith.constant 0 : i32
    %c0_i32_1 = arith.constant 0 : i32
    return %c0_i32, %arg0, %c0_i32_0 : i32, i32, i32
  }
  func.func @transform_1(%arg0: i32, %arg1: i32) -> (i32, i32, i32) {
    %c0_i32 = arith.constant 0 : i32
    %c0_i32_0 = arith.constant 0 : i32
    %c0_i32_1 = arith.constant 0 : i32
    return %arg1, %c0_i32, %c0_i32_0 : i32, i32, i32
  }
  func.func @transform_2(%arg0: i32, %arg1: i32) -> (i32, i32, i32) {
    %c0_i32 = arith.constant 0 : i32
    %c0_i32_0 = arith.constant 0 : i32
    %c0_i32_1 = arith.constant 0 : i32
    return %arg1, %c0_i32, %c0_i32_0 : i32, i32, i32
  }
  func.func @transform_3(%arg0: i32, %arg1: i32) -> (i32, i32, i32) {
    %c0_i32 = arith.constant 0 : i32
    %c0_i32_0 = arith.constant 0 : i32
    %c0_i32_1 = arith.constant 0 : i32
    return %arg1, %c0_i32, %c0_i32_0 : i32, i32, i32
  }
  func.func @transform_4(%arg0: i32, %arg1: i32) -> (i32, i32, i32) {
    %c0_i32 = arith.constant 0 : i32
    %c0_i32_0 = arith.constant 0 : i32
    %c0_i32_1 = arith.constant 0 : i32
    return %arg1, %c0_i32, %c0_i32_0 : i32, i32, i32
  }
  func.func @transform_5(%arg0: i32, %arg1: i32) -> (i32, i32, i32) {
    %c0_i32 = arith.constant 0 : i32
    %c0_i32_0 = arith.constant 0 : i32
    %c0_i32_1 = arith.constant 0 : i32
    return %arg1, %c0_i32, %c0_i32_0 : i32, i32, i32
  }
  func.func @transform_6(%arg0: i32, %arg1: i32) -> (i32, i32, i32) {
    %c0_i32 = arith.constant 0 : i32
    %c0_i32_0 = arith.constant 0 : i32
    %c0_i32_1 = arith.constant 0 : i32
    return %arg1, %c0_i32, %c0_i32_0 : i32, i32, i32
  }
  func.func @transform_7(%arg0: i32, %arg1: i32) -> (i32, i32, i32) {
    %c0_i32 = arith.constant 0 : i32
    %c0_i32_0 = arith.constant 0 : i32
    %c0_i32_1 = arith.constant 0 : i32
    return %arg1, %c0_i32, %c0_i32_0 : i32, i32, i32
  }
  func.func @transform_8(%arg0: i32, %arg1: i32) -> (i32, i32, i32) {
    %c0_i32 = arith.constant 0 : i32
    %c0_i32_0 = arith.constant 0 : i32
    %c0_i32_1 = arith.constant 0 : i32
    return %arg1, %c0_i32, %c0_i32_0 : i32, i32, i32
  }
  func.func @transform_9(%arg0: i32, %arg1: i32) -> (i32, i32, i32) {
    %c0_i32 = arith.constant 0 : i32
    %c0_i32_0 = arith.constant 0 : i32
    %c0_i32_1 = arith.constant 0 : i32
    return %arg1, %c0_i32, %c0_i32_0 : i32, i32, i32
  }
  func.func @transform_10(%arg0: i32, %arg1: i32) -> (i32, i32, i32) {
    %c0_i32 = arith.constant 0 : i32
    %c0_i32_0 = arith.constant 0 : i32
    %c0_i32_1 = arith.constant 0 : i32
    return %arg1, %c0_i32, %c0_i32_0 : i32, i32, i32
  }
  func.func @transform_11(%arg0: i32, %arg1: i32) -> (i32, i32, i32) {
    %c0_i32 = arith.constant 0 : i32
    %c0_i32_0 = arith.constant 0 : i32
    %c0_i32_1 = arith.constant 0 : i32
    return %c0_i32, %arg0, %c0_i32_0 : i32, i32, i32
  }
}

</mosaic_0001>

<bundles_post_ra>
// kernel: language_mixer_forward.1
= control target key start
LH: loop header
LB: loop body
LE: loop exit
PB: predicated region body
PF: predicated region fallthrough
CT: control target
= control target key end

     0   :  { %s1833_s17 = smov 0   ;;  %s1835_s18 = smov 0   ;;  %s2286_s0 = inlined_call_operand.vmem [shape: f32[8,2,32], index: 0, kind: input, shape index: {}]   ;;  %s2287_s1 = inlined_call_operand.vmem [shape: f32[2,8,8], index: 1, kind: input, shape index: {}]   ;;  %s2288_s2 = inlined_call_operand.vmem [shape: f32[2,8,1], index: 2, kind: input, shape index: {}]   ;;  %s2289_s3 = inlined_call_operand.vmem [shape: f32[2,1,32], index: 3, kind: input, shape index: {}]   ;;  %s2290_s4 = inlined_call_operand.vmem [shape: f32[2,1,32], index: 4, kind: input, shape index: {}]   ;;  %s2291_s5 = inlined_call_operand.vmem [shape: f32[2,1,32], index: 5, kind: input, shape index: {}]   ;;  %s2292_s6 = inlined_call_operand.vmem [shape: f32[2,1,32], index: 6, kind: input, shape index: {}]   ;;  %s2293_s7 = inlined_call_operand.vmem [shape: f32[2,32,128], index: 7, kind: input, shape index: {}]   ;;  %s2294_s8 = inlined_call_operand.vmem [shape: f32[2,1,128], index: 8, kind: input, shape index: {}]   ;;  %s2295_s9 = inlined_call_operand.vmem [shape: f32[2,128,32], index: 9, kind: input, shape index: {}]   ;;  %s2296_s10 = inlined_call_operand.vmem [shape: f32[2,1,32], index: 10, kind: input, shape index: {}]   ;;  %s2297_s11 = inlined_call_operand.vmem [shape: f32[8,2,32], index: 11, kind: output, shape index: {}]  }
   0x1   :  { %2300 = sst [smem:[#allocation5_spill]] %s2287_s1  ;;  %s1837_s19 = smov 0  }
   0x2 LB: > { %2301 = sst [smem:[#allocation2_spill]] %s1760_s18  ;;  %s30_s20 = sadd.s32 1, %s1760_s18  ;;  %s1764_s19 = sphi %s1837_s19, %s21_s19   ;;  %s1760_s18 = sphi %s1835_s18, %s2310_s18   ;;  %s1756_s17 = sphi %s1833_s17, %s2309_s17  }
   0x3   : > { %2302 = sst [smem:[#allocation3_spill]] %s1764_s19  ;;  %p1534_p0 = scmp.ge.s32.totalorder %s1764_s19, 1 }
   0x4   : > { %p31_p1 = scmp.ge.s32.totalorder %s30_s20, 2  ;;  %p434_p2 = scmp.lt.s32.totalorder %s1764_s19, 3 }
   0x6   : > { %s2312_s20 = smov (%p31_p1, %s30_s20), 0  ;;  %p435_p3 = pnand %p1534_p0, %p434_p2 }
   0x7   : > { %2303 = sst [smem:[#allocation4_spill]] %s2312_s20  ;;  %p512_p4 = scmp.lt.s32.totalorder (!%p435_p3), %s1756_s17, 1 }
   0x8   : > { %438 = sbr.rel (%p435_p3) target bundleno = 1610 (0x64a), region = 64  ;;  %s2304_s1 = sld [smem:[#allocation5_spill]] (!%p435_p3) }
   0x9   : > { %p1541_p5 = scmp.ne.s32.totalorder (!%p435_p3), %s1756_s17, 0 }
   0xf   : > { %s1851_s21 = scalar_select %p512_p4, %s1756_s17, 1 }
  0x10   : > { %555 = sbr.rel (%p1541_p5) target bundleno = 23 (0x17), region = 68  ;;  %v556_v0 = vld [vmem:[%s2286_s0] sm:$0x3] (!%p1541_p5)  ;;  %vm564_vm0 = vcmask (!%p1541_p5), 254976   ;;  %v557_v1 = vld [vmem:[%s2286_s0 + $0x2] sm:$0x3] (!%p1541_p5) }
  0x11   : > { %s1535_s22 = sshll.u32 %s1851_s21, 3  ;;  %s531_s25 = scalar_lea.vmem %s2292_s6, %s1851_s21  ;;  %565 = vst.msk [vmem:[%s2297_s11] sm:$0x3] (!%p1541_p5), %vm564_vm0, %v556_v0  ;;  %566 = vst.msk [vmem:[%s2297_s11 + $0x2] sm:$0x3] (!%p1541_p5), %vm564_vm0, %v557_v1 }
  0x12   : > { %s1861_s28 = scalar_lea.vmem %s2304_s1, %s1535_s22  ;;  %s1866_s12 = scalar_lea.vmem %s2288_s2, %s1535_s22  ;;  %v558_v2 = vld [vmem:[%s2286_s0 + $0x4] sm:$0x3] (!%p1541_p5)  ;;  %v559_v3 = vld [vmem:[%s2286_s0 + $0x6] sm:$0x3] (!%p1541_p5)  ;;  %v560_v4 = vld [vmem:[%s2286_s0 + $0x8] sm:$0x3] (!%p1541_p5) }
  0x13   : > { %s1554_s26 = sshll.u32 %s1851_s21, 5  ;;  %s539_s30 = scalar_lea.vmem %s2294_s8, %s1851_s21  ;;  %567 = vst.msk [vmem:[%s2297_s11 + $0x4] sm:$0x3] (!%p1541_p5), %vm564_vm0, %v558_v2  ;;  %568 = vst.msk [vmem:[%s2297_s11 + $0x6] sm:$0x3] (!%p1541_p5), %vm564_vm0, %v559_v3 }
  0x14   : > { %s1884_s19 = scalar_lea.vmem %s2293_s7, %s1554_s26  ;;  %s1555_s13 = sshll.u32 %s1851_s21, 7  ;;  %569 = vst.msk [vmem:[%s2297_s11 + $0x8] sm:$0x3] (!%p1541_p5), %vm564_vm0, %v560_v4  ;;  %v561_v5 = vld [vmem:[%s2286_s0 + $0xa] sm:$0x3] (!%p1541_p5) }
  0x15   : > { %s547_s20 = scalar_lea.vmem %s2296_s10, %s1851_s21  ;;  %s1898_s23 = scalar_lea.vmem %s2295_s9, %s1555_s13  ;;  %v562_v6 = vld [vmem:[%s2286_s0 + $0xc] sm:$0x3] (!%p1541_p5)  ;;  %v563_v7 = vld [vmem:[%s2286_s0 + $0xe] sm:$0x3] (!%p1541_p5)  ;;  %570 = vst.msk [vmem:[%s2297_s11 + $0xa] sm:$0x3] (!%p1541_p5), %vm564_vm0, %v561_v5 }
  0x16   : > { %571 = vst.msk [vmem:[%s2297_s11 + $0xc] sm:$0x3] (!%p1541_p5), %vm564_vm0, %v562_v6  ;;  %572 = vst.msk [vmem:[%s2297_s11 + $0xe] sm:$0x3] (!%p1541_p5), %vm564_vm0, %v563_v7 }
  0x17 PF: > { %vm583_vm1 = vcmask 254976   ;;  %s2305_s26 = scalar_lea.vmem %s2289_s3, %s1851_s21  ;;  %s2306_s29 = scalar_lea.vmem %s2290_s4, %s1851_s21  ;;  %vm1769_vm2 = vmmov 0   ;;  %vm772_vm3 = vcmask 261120   ;;  %vm780_vm4 = vcmask 64512  }
  0x18   : > { %v1951_v8 = vld [vmem:[%s2297_s11] sm:$0x3]  ;;  %v1965_v12 = vld [vmem:[%s2297_s11 + $0x2] sm:$0x3]  ;;  %s1772_s15 = smov 96   ;;  %s2307_s14 = scalar_lea.vmem %s2291_s5, %s1851_s21 }
  0x19   : > { %v584_v10 = vsel %vm583_vm1, %v1951_v8, 0.0  ;;  %v587_v14 = vsel %vm583_vm1, %v1965_v12, 0.0 }
  0x1a   : > { %v1956_v9 = vld [vmem:[%s2297_s11 + $0x4] sm:$0x3]  ;;  %v1970_v13 = vld [vmem:[%s2297_s11 + $0x6] sm:$0x3]  ;;  %585 = vadd.xlane.f32.xlu0 %v584_v10 }
  0x1b   : > { %v590_v11 = vsel %vm583_vm1, %v1956_v9, 0.0  ;;  %v593_v15 = vsel %vm583_vm1, %v1970_v13, 0.0  ;;  %v1979_v16 = vld [vmem:[%s2297_s11 + $0x8] sm:$0x3] }
  0x1c   : > { %591 = vadd.xlane.f32.xlu1 %v590_v11  ;;  %v1984_v17 = vld [vmem:[%s2297_s11 + $0xa] sm:$0x3]  ;;  %v596_v18 = vsel %vm583_vm1, %v1979_v16, 0.0 }
  0x1d   : > { %v599_v19 = vsel %vm583_vm1, %v1984_v17, 0.0  ;;  %v1993_v20 = vld [vmem:[%s2297_s11 + $0xc] sm:$0x3]  ;;  %v1998_v21 = vld [vmem:[%s2297_s11 + $0xe] sm:$0x3] }
  0x1e   : > { %588 = vadd.xlane.f32.xlu0 %v587_v14  ;;  %v602_v22 = vsel %vm583_vm1, %v1993_v20, 0.0  ;;  %v605_v23 = vsel %vm583_vm1, %v1998_v21, 0.0 }
  0x20   : > { %594 = vadd.xlane.f32.xlu1 %v593_v15 }
  0x22   : > { %597 = vadd.xlane.f32.xlu0 %v596_v18 }
  0x24   : > { %600 = vadd.xlane.f32.xlu1 %v599_v19 }
  0x26   : > { %603 = vadd.xlane.f32.xlu0 %v602_v22 }
  0x28   : > { %606 = vadd.xlane.f32.xlu1 %v605_v23 }
  0xa7   : > { %v586_v24 = vpop.xlane.xlu0 %585 }
  0xa8   : > { %v609_v26 = vmul.f32 0.03125, %v586_v24 }
  0xa9   : > { %v592_v25 = vpop.xlane.xlu1 %591 }
  0xaa   : > { %v611_v27 = vmul.f32 0.03125, %v592_v25  ;;  %v2005_v28 = vsub.f32 %v1951_v8, %v609_v26 }
  0xab   : > { %v589_v30 = vpop.xlane.xlu0 %588 }
  0xac   : > { %v2008_v29 = vsub.f32 %v1956_v9, %v611_v27  ;;  %v610_v32 = vmul.f32 0.03125, %v589_v30  ;;  %v625_v34 = vmul.f32 %v2005_v28, %v2005_v28 }
  0xad   : > { %v595_v31 = vpop.xlane.xlu1 %594 }
  0xae   : > { %v612_v33 = vmul.f32 0.03125, %v595_v31  ;;  %v627_v35 = vmul.f32 %v2008_v29, %v2008_v29  ;;  %v2015_v36 = vsub.f32 %v1965_v12, %v610_v32  ;;  %v633_v38 = vsel %vm583_vm1, %v625_v34, 0.0 }
  0xaf   : > { %634 = vadd.xlane.f32.xlu0 %v633_v38  ;;  %v598_v39 = vpop.xlane.xlu0 %597 }
  0xb0   : > { %v2018_v37 = vsub.f32 %v1970_v13, %v612_v33  ;;  %v639_v41 = vsel %vm583_vm1, %v627_v35, 0.0  ;;  %v613_v42 = vmul.f32 0.03125, %v598_v39  ;;  %v626_v44 = vmul.f32 %v2015_v36, %v2015_v36 }
  0xb1   : > { %v601_v40 = vpop.xlane.xlu1 %600 }
  0xb2   : > { %v614_v43 = vmul.f32 0.03125, %v601_v40  ;;  %v628_v45 = vmul.f32 %v2018_v37, %v2018_v37  ;;  %v2027_v46 = vsub.f32 %v1979_v16, %v613_v42  ;;  %v636_v48 = vsel %vm583_vm1, %v626_v44, 0.0 }
  0xb3   : > { %640 = vadd.xlane.f32.xlu0 %v639_v41  ;;  %637 = vadd.xlane.f32.xlu1 %v636_v48  ;;  %v604_v49 = vpop.xlane.xlu0 %603  ;;  %v1766_v48 = vmov 1983009808  }
  0xb4   : > { %v2030_v47 = vsub.f32 %v1984_v17, %v614_v43  ;;  %v642_v51 = vsel %vm583_vm1, %v628_v45, 0.0  ;;  %v615_v52 = vmul.f32 0.03125, %v604_v49  ;;  %v629_v54 = vmul.f32 %v2027_v46, %v2027_v46  ;;  %v1542_v45 = vld [vmem:[%s2305_s26] ss:$0 sm:$0xff] }
  0xb5   : > { %v607_v50 = vpop.xlane.xlu1 %606  ;;  %v720_v49 = vunpack.c.l.s4 %v1766_v48 }
  0xb6   : > { %v616_v53 = vmul.f32 0.03125, %v607_v50  ;;  %v630_v55 = vmul.f32 %v2030_v47, %v2030_v47  ;;  %v2039_v56 = vsub.f32 %v1993_v20, %v615_v52  ;;  %v645_v58 = vsel %vm583_vm1, %v629_v54, 0.0 }
  0xb7   : > { %643 = vadd.xlane.f32.xlu1 %v642_v51  ;;  %646 = vadd.xlane.f32.xlu0 %v645_v58  ;;  %v722_v50 = vlaneseq }
  0xb8   : > { %v2042_v57 = vsub.f32 %v1998_v21, %v616_v53  ;;  %v648_v59 = vsel %vm583_vm1, %v630_v55, 0.0  ;;  %v631_v60 = vmul.f32 %v2039_v56, %v2039_v56 }
  0xba   : > { %v632_v61 = vmul.f32 %v2042_v57, %v2042_v57  ;;  %v651_v62 = vsel %vm583_vm1, %v631_v60, 0.0  ;;  %v721_v60 = vunpack.c.0.s8 %v720_v49 }
  0xbb   : > { %649 = vadd.xlane.f32.xlu1 %v648_v59  ;;  %652 = vadd.xlane.f32.xlu0 %v651_v62 }
  0xbc   : > { %v654_v63 = vsel %vm583_vm1, %v632_v61, 0.0  ;;  %v723_v61 = vshrl.u32 %v722_v50, 7 }
  0xbf   : > { %655 = vadd.xlane.f32.xlu1 %v654_v63 }
 0x13c   : > { %v635_v0 = vpop.xlane.xlu0 %634 }
 0x13d   : > { %v657_v1 = vmul.f32 0.03125, %v635_v0 }
 0x13f   : > { %v665_v6 = vadd.f32 1e-05, %v657_v1 }
 0x140   : > { %v638_v2 = vpop.xlane.xlu1 %637  ;;  %v641_v3 = vpop.xlane.xlu0 %640 }
 0x141   : > { %v658_v4 = vmul.f32 0.03125, %v638_v2  ;;  %v659_v5 = vmul.f32 0.03125, %v641_v3  ;;  %v1767_v3 = vmov 1934713408  }
 0x143   : > { %v666_v7 = vadd.f32 1e-05, %v658_v4  ;;  %v667_v10 = vadd.f32 1e-05, %v659_v5  ;;  %v752_v4 = vunpack.c.l.s4 %v1767_v3 }
 0x144   : > { %v644_v11 = vpop.xlane.xlu1 %643  ;;  %v647_v14 = vpop.xlane.xlu0 %646 }
 0x145   : > { %1706 = vrsqrt.f32 %v666_v7  ;;  %v660_v15 = vmul.f32 0.03125, %v644_v11  ;;  %v661_v18 = vmul.f32 0.03125, %v647_v14 }
 0x146   : > { %1708 = vrsqrt.f32 %v667_v10 }
 0x147   : > { %1710 = vrsqrt.f32 %v665_v6  ;;  %v668_v19 = vadd.f32 1e-05, %v660_v15  ;;  %v669_v22 = vadd.f32 1e-05, %v661_v18  ;;  %v753_v18 = vunpack.c.0.s8 %v752_v4 }
 0x148   : > { %v650_v23 = vpop.xlane.xlu1 %649  ;;  %v653_v24 = vpop.xlane.xlu0 %652 }
 0x149   : > { %1712 = vrsqrt.f32 %v668_v19  ;;  %v662_v25 = vmul.f32 0.03125, %v650_v23  ;;  %v663_v26 = vmul.f32 0.03125, %v653_v24  ;;  %v1768_v19 = vmov 0.0  }
 0x14a   : > { %1714 = vrsqrt.f32 %v669_v22  ;;  %1582 = vmatprep.subr.mxu1 %v1768_v19  ;;  %1584 = vmatprep.mubr.msk.f32.mxu1 %vm1769_vm2, %v1768_v19 }
 0x14b   : > { %v670_v27 = vadd.f32 1e-05, %v662_v25  ;;  %v671_v30 = vadd.f32 1e-05, %v663_v26 }
 0x14c   : > { %v656_v31 = vpop.xlane.xlu1 %655 }
 0x14d   : > { %1716 = vrsqrt.f32 %v670_v27  ;;  %v664_v32 = vmul.f32 0.03125, %v656_v31  ;;  %v1770_v27 = vmov 0  }
 0x14e   : > { %1718 = vrsqrt.f32 %v671_v30  ;;  %1704 = vset.pattern.permute.xlu1 %v1770_v27  ;;  %1705 = vset.pattern.permute.xlu0 %v1770_v27 }
 0x14f   : > { %v1707_v33 = vpop.eup %1706  ;;  %v672_v34 = vadd.f32 1e-05, %v664_v32 }
 0x150   : > { %v1709_v35 = vpop.eup %1708  ;;  %v682_v39 = vmul.f32 %v1707_v33, %v2015_v36  ;;  %v756_v33 = vsub.s32 %v753_v18, %v723_v61 }
 0x151   : > { %v1711_v38 = vpop.eup %1710  ;;  %1720 = vrsqrt.f32 %v672_v34  ;;  %v683_v40 = vmul.f32 %v1709_v35, %v2008_v29 }
 0x152   : > { %v681_v43 = vmul.f32 %v1711_v38, %v2005_v28  ;;  %v696_v51 = vmul.f32 %v1542_v45, %v682_v39  ;;  %v1543_v28 = vld [vmem:[%s2306_s29] ss:$0 sm:$0xff] }
 0x153   : > { %v1713_v41 = vpop.eup %1712  ;;  %v697_v52 = vmul.f32 %v1542_v45, %v683_v40 }
 0x154   : > { %v1715_v42 = vpop.eup %1714  ;;  %v684_v44 = vmul.f32 %v1713_v41, %v2018_v37  ;;  %v695_v54 = vmul.f32 %v1542_v45, %v681_v43  ;;  %v710_v63 = vadd.f32 %v1543_v28, %v696_v51 }
 0x155   : > { %v685_v36 = vmul.f32 %v1715_v42, %v2027_v46  ;;  %v711_v0 = vadd.f32 %v1543_v28, %v697_v52  ;;  %v717_v42 = vld [vmem:[%s1861_s28] sm:$0xff] }
 0x156   : > { %v698_v53 = vmul.f32 %v1542_v45, %v684_v44  ;;  %v709_v6 = vadd.f32 %v1543_v28, %v695_v54 }
 0x157   : > { %v1717_v29 = vpop.eup %1716  ;;  %v699_v62 = vmul.f32 %v1542_v45, %v685_v36 }
 0x158   : > { %v1719_v37 = vpop.eup %1718  ;;  %v686_v55 = vmul.f32 %v1717_v29, %v2030_v47  ;;  %v712_v58 = vadd.f32 %v1543_v28, %v698_v53  ;;  %v2070_v47 = vsub.s32 %v721_v60, %v723_v61  ;;  %v718_v14 = vcombine.low %v709_v6, %v711_v0 }
 0x159   : > { %v687_v59 = vmul.f32 %v1719_v37, %v2039_v56  ;;  %v713_v56 = vadd.f32 %v1543_v28, %v699_v62 }
 0x15a   : > { %v700_v46 = vmul.f32 %v1542_v45, %v686_v55  ;;  %v726_v7 = vcombine.low %v710_v63, %v712_v58  ;;  %v725_v25 = vrot.slane %v718_v14, %v2070_v47 }
 0x15b   : > { %v1721_v1 = vpop.eup %1720  ;;  %v701_v2 = vmul.f32 %v1542_v45, %v687_v59 }
 0x15c   : > { %v688_v5 = vmul.f32 %v1721_v1, %v2042_v57  ;;  %v714_v15 = vadd.f32 %v1543_v28, %v700_v46  ;;  %v733_v23 = vrot.slane %v726_v7, %v2070_v47  ;;  %v774_v57 = vld [vmem:[%s1866_s12] sm:$0xff]  ;;  %s1771_s12 = smov 32  }
 0x15d   : > { %v715_v10 = vadd.f32 %v1543_v28, %v701_v2  ;;  %777 = vperm.xlu1 %1704, %v774_v57  }
 0x15e   : > { %v702_v11 = vmul.f32 %v1542_v45, %v688_v5  ;;  %v750_v32 = vcombine.low %v725_v25, %v733_v23 }
 0x15f   : > { %v734_v24 = vcombine.low %v713_v56, %v715_v10 }
 0x160   : > { %v716_v22 = vadd.f32 %v1543_v28, %v702_v11  ;;  %v757_v35 = vrot.slane %v750_v32, %v756_v33 }
 0x161   : > { %v741_v30 = vrot.slane %v734_v24, %v2070_v47 }
 0x162   : > { %v742_v26 = vcombine.low %v714_v15, %v716_v22 }
 0x164   : > { %v749_v31 = vrot.slane %v742_v26, %v2070_v47 }
 0x166   : > { %v758_v34 = vcombine.low %v741_v30, %v749_v31 }
 0x168   : > { %v765_v38 = vrot.slane %v758_v34, %v756_v33 }
 0x16a   : > { %v767_v39 = vcombine.high %v757_v35, %v765_v38  ;;  %v766_v40 = vcombine.low %v757_v35, %v765_v38 }
 0x16c   : > { %769 = vrot.lane.b32.xlu0 %v767_v39, %s1771_s12 }
 0x1dc   : > { %v778_v44 = vpop.permute.xlu1 %777 }
 0x1de   : > { %v770_v41 = vpop.permute.xlu0 %769 }
 0x1df   : > { %v773_v43 = vsel %vm772_vm3, %v766_v40, %v770_v41 }
 0x1e0   : > { %1583 = vmatpush3.msra.mxu1 %v773_v43 }
 0x1e1   : > { %1585 = vmatmul.mubr.msk.f32.vlgmr.msra.gmra.mrb[0].mxu1 %vm780_vm4, %v717_v42 }
 0x2b4   : > { %v850_v45 = vpop.f32.mrb[0].mxu1 }
 0x2b5   : > { %v851_v48 = vadd.f32 %v850_v45, %v778_v44  ;;  %v1586_v49 = vpop.f32.mrb[1].mxu1 }
 0x2b7   : > { %855 = vrot.lane.b32.xlu1 %v851_v48, %s1772_s15  ;;  %v858_v50 = vcombine.high %v851_v48, %v1768_v19  ;;  %v865_v52 = vrot.slane %v851_v48, %v2070_v47 }
 0x2b9   : > { %v872_v29 = vrot.slane %v858_v50, %v2070_v47 }
 0x329   : > { %v856_v51 = vpop.permute.xlu1 %855 }
 0x32a   : > { %v873_v53 = vcombine.high %v856_v51, %v1768_v19  ;;  %v880_v36 = vrot.slane %v856_v51, %v2070_v47 }
 0x32c   : > { %v887_v28 = vrot.slane %v873_v53, %v2070_v47  ;;  %v888_v37 = vcombine.low %v865_v52, %v880_v36  ;;  %v889_v54 = vcombine.high %v865_v52, %v880_v36 }
 0x32e   : > { %v896_v55 = vrot.slane %v888_v37, %v756_v33  ;;  %v903_v58 = vrot.slane %v889_v54, %v756_v33  ;;  %v904_v59 = vcombine.low %v872_v29, %v887_v28  ;;  %v905_v60 = vcombine.high %v872_v29, %v887_v28 }
 0x330   : > { %v2088_v61 = vadd.f32 %v903_v58, %v1956_v9  ;;  %v2091_v62 = vadd.f32 %v896_v55, %v1951_v8  ;;  %v920_v63 = vcombine.high %v896_v55, %v1768_v19  ;;  %v912_v0 = vrot.slane %v904_v59, %v756_v33 }
 0x331   : > { %v921_v1 = vcombine.high %v903_v58, %v1768_v19  ;;  %v919_v46 = vrot.slane %v905_v60, %v756_v33  ;;  %v1066_v60 = vld [vmem:[%s1884_s19] sm:$0xff] }
 0x332   : > { %v940_v2 = vsel %vm583_vm1, %v2088_v61, 0.0  ;;  %v934_v3 = vsel %vm583_vm1, %v2091_v62, 0.0  ;;  %v2100_v4 = vadd.f32 %v920_v63, %v1965_v12  ;;  %v2103_v9 = vadd.f32 %v912_v0, %v1979_v16  ;;  %v1067_v63 = vld [vmem:[%s1884_s19 + $0x8] sm:$0xff] }
 0x333   : > { %941 = vadd.xlane.f32.xlu0 %v940_v2  ;;  %935 = vadd.xlane.f32.xlu1 %v934_v3  ;;  %v2106_v8 = vadd.f32 %v921_v1, %v1970_v13  ;;  %v2113_v7 = vadd.f32 %v919_v46, %v1993_v20  ;;  %v922_v12 = vcombine.high %v912_v0, %v1768_v19  ;;  %v1068_v1 = vld [vmem:[%s1884_s19 + $0x10] sm:$0xff]  ;;  %v1208_v3 = vld [vmem:[%s1898_s23] sm:$0xff] }
 0x334   : > { %v937_v5 = vsel %vm583_vm1, %v2100_v4, 0.0  ;;  %v946_v6 = vsel %vm583_vm1, %v2103_v9, 0.0  ;;  %v923_v11 = vcombine.high %v919_v46, %v1768_v19  ;;  %v1633_v0 = vpack.c.bf16 %v1067_v63, %v1066_v60  ;;  %v1069_v46 = vld [vmem:[%s1884_s19 + $0x18] sm:$0xff] }
 0x335   : > { %v943_v16 = vsel %vm583_vm1, %v2106_v8, 0.0  ;;  %v952_v13 = vsel %vm583_vm1, %v2113_v7, 0.0  ;;  %v2121_v10 = vadd.f32 %v922_v12, %v1984_v17  ;;  %v1637_v2 = vpack.c.bf16 %v1069_v46, %v1068_v1 }
 0x336   : > { %v2127_v56 = vadd.f32 %v923_v11, %v1998_v21  ;;  %1634 = vmatprep.subr.bf16.mxu1 %v1633_v0  ;;  %v1212_v11 = vld [vmem:[%s1898_s23 + $0x20] sm:$0xff] }
 0x337   : > { %938 = vadd.xlane.f32.xlu0 %v937_v5  ;;  %947 = vadd.xlane.f32.xlu1 %v946_v6  ;;  %v949_v20 = vsel %vm583_vm1, %v2121_v10, 0.0  ;;  %v1209_v5 = vld [vmem:[%s1898_s23 + $0x8] sm:$0xff]  ;;  %v1210_v6 = vld [vmem:[%s1898_s23 + $0x10] sm:$0xff] }
 0x338   : > { %v955_v14 = vsel %vm583_vm1, %v2127_v56, 0.0  ;;  %1636 = vmatpush3.bf16.msra.mxu1 %v1633_v0  ;;  %v1641_v12 = vpack.c.bf16 %v1209_v5, %v1208_v3 }
 0x339   : > { %1638 = vmatprep.subr.bf16.mxu1 %v1637_v2 }
 0x33a   : > { %1642 = vmatprep.subr.bf16.mxu0 %v1641_v12 }
 0x33b   : > { %944 = vadd.xlane.f32.xlu0 %v943_v16  ;;  %953 = vadd.xlane.f32.xlu1 %v952_v13  ;;  %v1211_v16 = vld [vmem:[%s1898_s23 + $0x18] sm:$0xff] }
 0x33c   : > { %1640 = vmatpush3.bf16.msra.mxu1 %v1637_v2  ;;  %v1645_v13 = vpack.c.bf16 %v1211_v16, %v1210_v6  ;;  %1644 = vmatpush3.bf16.msra.mxu0 %v1641_v12 }
 0x33e   : > { %1646 = vmatprep.subr.bf16.mxu0 %v1645_v13 }
 0x33f   : > { %950 = vadd.xlane.f32.xlu0 %v949_v20  ;;  %v1213_v20 = vld [vmem:[%s1898_s23 + $0x28] sm:$0xff] }
 0x340   : > { %1648 = vmatpush3.bf16.msra.mxu0 %v1645_v13 }
 0x343   : > { %956 = vadd.xlane.f32.xlu0 %v955_v14  ;;  %v1649_v14 = vpack.c.bf16 %v1213_v20, %v1212_v11 }
 0x345   : > { %1650 = vmatprep.subr.bf16.mxu0 %v1649_v14 }
 0x346   : > { %1652 = vmatpush3.bf16.msra.mxu0 %v1649_v14 }
 0x3c0   : > { %v942_v15 = vpop.xlane.xlu0 %941  ;;  %v936_v18 = vpop.xlane.xlu1 %935 }
 0x3c1   : > { %v960_v22 = vmul.f32 0.03125, %v942_v15  ;;  %v958_v17 = vmul.f32 0.03125, %v936_v18 }
 0x3c3   : > { %v2132_v23 = vsub.f32 %v2088_v61, %v960_v22  ;;  %v2135_v19 = vsub.f32 %v2091_v62, %v958_v17 }
 0x3c4   : > { %v939_v24 = vpop.xlane.xlu0 %938  ;;  %v948_v57 = vpop.xlane.xlu1 %947 }
 0x3c5   : > { %v959_v25 = vmul.f32 0.03125, %v939_v24  ;;  %v962_v21 = vmul.f32 0.03125, %v948_v57  ;;  %v974_v26 = vmul.f32 %v2135_v19, %v2135_v19  ;;  %v976_v27 = vmul.f32 %v2132_v23, %v2132_v23 }
 0x3c7   : > { %v2142_v30 = vsub.f32 %v2100_v4, %v959_v25  ;;  %v2145_v31 = vsub.f32 %v2103_v9, %v962_v21  ;;  %v982_v32 = vsel %vm583_vm1, %v974_v26, 0.0  ;;  %v988_v40 = vsel %vm583_vm1, %v976_v27, 0.0 }
 0x3c8   : > { %v945_v33 = vpop.xlane.xlu0 %944  ;;  %983 = vadd.xlane.f32.xlu1 %v982_v32  ;;  %v954_v34 = vpop.xlane.xlu1 %953 }
 0x3c9   : > { %v961_v35 = vmul.f32 0.03125, %v945_v33  ;;  %v964_v38 = vmul.f32 0.03125, %v954_v34  ;;  %v975_v39 = vmul.f32 %v2142_v30, %v2142_v30  ;;  %v978_v44 = vmul.f32 %v2145_v31, %v2145_v31 }
 0x3cb   : > { %v2152_v41 = vsub.f32 %v2106_v8, %v961_v35  ;;  %v2155_v42 = vsub.f32 %v2113_v7, %v964_v38  ;;  %v985_v43 = vsel %vm583_vm1, %v975_v39, 0.0  ;;  %v994_v51 = vsel %vm583_vm1, %v978_v44, 0.0 }
 0x3cc   : > { %989 = vadd.xlane.f32.xlu1 %v988_v40  ;;  %986 = vadd.xlane.f32.xlu0 %v985_v43  ;;  %v951_v45 = vpop.xlane.xlu0 %950 }
 0x3cd   : > { %v963_v48 = vmul.f32 0.03125, %v951_v45  ;;  %v977_v49 = vmul.f32 %v2152_v41, %v2152_v41  ;;  %v980_v53 = vmul.f32 %v2155_v42, %v2155_v42 }
 0x3cf   : > { %v2163_v50 = vsub.f32 %v2121_v10, %v963_v48  ;;  %v991_v52 = vsel %vm583_vm1, %v977_v49, 0.0  ;;  %v1000_v54 = vsel %vm583_vm1, %v980_v53, 0.0 }
 0x3d0   : > { %995 = vadd.xlane.f32.xlu1 %v994_v51  ;;  %992 = vadd.xlane.f32.xlu0 %v991_v52  ;;  %v957_v36 = vpop.xlane.xlu0 %956 }
 0x3d1   : > { %v965_v29 = vmul.f32 0.03125, %v957_v36  ;;  %v979_v28 = vmul.f32 %v2163_v50, %v2163_v50 }
 0x3d3   : > { %v2172_v37 = vsub.f32 %v2127_v56, %v965_v29  ;;  %v997_v55 = vsel %vm583_vm1, %v979_v28, 0.0 }
 0x3d4   : > { %1001 = vadd.xlane.f32.xlu1 %v1000_v54  ;;  %998 = vadd.xlane.f32.xlu0 %v997_v55  ;;  %v1545_v54 = vld [vmem:[%s2307_s14] ss:$0 sm:$0xff] }
 0x3d5   : > { %v981_v58 = vmul.f32 %v2172_v37, %v2172_v37 }
 0x3d7   : > { %v1003_v59 = vsel %vm583_vm1, %v981_v58, 0.0 }
 0x3d8   : > { %1004 = vadd.xlane.f32.xlu0 %v1003_v59 }
 0x455   : > { %v984_v15 = vpop.xlane.xlu1 %983 }
 0x456   : > { %v1006_v18 = vmul.f32 0.03125, %v984_v15 }
 0x458   : > { %v1014_v22 = vadd.f32 1e-05, %v1006_v18 }
 0x459   : > { %v990_v17 = vpop.xlane.xlu1 %989  ;;  %v987_v24 = vpop.xlane.xlu0 %986 }
 0x45a   : > { %v1008_v57 = vmul.f32 0.03125, %v990_v17  ;;  %v1007_v25 = vmul.f32 0.03125, %v987_v24  ;;  %1722 = vrsqrt.f32 %v1014_v22 }
 0x45c   : > { %v1016_v21 = vadd.f32 1e-05, %v1008_v57  ;;  %v1015_v26 = vadd.f32 1e-05, %v1007_v25 }
 0x45d   : > { %v996_v27 = vpop.xlane.xlu1 %995  ;;  %v993_v32 = vpop.xlane.xlu0 %992 }
 0x45e   : > { %1724 = vrsqrt.f32 %v1016_v21  ;;  %v1010_v33 = vmul.f32 0.03125, %v996_v27  ;;  %v1009_v34 = vmul.f32 0.03125, %v993_v32 }
 0x45f   : > { %1726 = vrsqrt.f32 %v1015_v26 }
 0x460   : > { %v1018_v35 = vadd.f32 1e-05, %v1010_v33  ;;  %v1017_v38 = vadd.f32 1e-05, %v1009_v34 }
 0x461   : > { %v1002_v39 = vpop.xlane.xlu1 %1001  ;;  %v999_v40 = vpop.xlane.xlu0 %998 }
 0x462   : > { %1728 = vrsqrt.f32 %v1018_v35  ;;  %v1012_v43 = vmul.f32 0.03125, %v1002_v39  ;;  %v1011_v44 = vmul.f32 0.03125, %v999_v40  ;;  %v1214_v35 = vld [vmem:[%s1898_s23 + $0x30] sm:$0xff]  ;;  %v1216_v40 = vld [vmem:[%s1898_s23 + $0x40] sm:$0xff] }
 0x463   : > { %1730 = vrsqrt.f32 %v1017_v38  ;;  %v1215_v38 = vld [vmem:[%s1898_s23 + $0x38] sm:$0xff] }
 0x464   : > { %v1020_v45 = vadd.f32 1e-05, %v1012_v43  ;;  %v1019_v48 = vadd.f32 1e-05, %v1011_v44  ;;  %v1723_v49 = vpop.eup %1722  ;;  %v1653_v39 = vpack.c.bf16 %v1215_v38, %v1214_v35  ;;  %v1217_v43 = vld [vmem:[%s1898_s23 + $0x48] sm:$0xff] }
 0x465   : > { %v1005_v51 = vpop.xlane.xlu0 %1004  ;;  %v1030_v36 = vmul.f32 %v1723_v49, %v2135_v19  ;;  %v1546_v19 = vld [vmem:[%s531_s25] ss:$0 sm:$0xff]  ;;  %v1657_v44 = vpack.c.bf16 %v1217_v43, %v1216_v40 }
 0x466   : > { %1732 = vrsqrt.f32 %v1020_v45  ;;  %v1013_v52 = vmul.f32 0.03125, %v1005_v51  ;;  %1654 = vmatprep.subr.bf16.mxu0 %v1653_v39  ;;  %v1218_v45 = vld [vmem:[%s1898_s23 + $0x50] sm:$0xff]  ;;  %v1220_v51 = vld [vmem:[%s1898_s23 + $0x60] sm:$0xff] }
 0x467   : > { %1734 = vrsqrt.f32 %v1019_v48  ;;  %v1044_v60 = vmul.f32 %v1545_v54, %v1030_v36  ;;  %1656 = vmatpush3.bf16.msra.mxu0 %v1653_v39  ;;  %v1219_v48 = vld [vmem:[%s1898_s23 + $0x58] sm:$0xff]  ;;  %v1222_v36 = vld [vmem:[%s1898_s23 + $0x70] sm:$0xff] }
 0x468   : > { %v1725_v53 = vpop.eup %1724  ;;  %v1021_v29 = vadd.f32 1e-05, %v1013_v52  ;;  %1658 = vmatprep.subr.bf16.mxu0 %v1657_v44  ;;  %v1661_v49 = vpack.c.bf16 %v1219_v48, %v1218_v45  ;;  %v1221_v52 = vld [vmem:[%s1898_s23 + $0x68] sm:$0xff] }
 0x469   : > { %v1727_v28 = vpop.eup %1726  ;;  %v1032_v55 = vmul.f32 %v1725_v53, %v2132_v23  ;;  %v1058_v6 = vadd.f32 %v1546_v19, %v1044_v60  ;;  %v1665_v53 = vpack.c.bf16 %v1221_v52, %v1220_v51 }
 0x46a   : > { %v1031_v58 = vmul.f32 %v1727_v28, %v2142_v30  ;;  %1736 = vrsqrt.f32 %v1021_v29  ;;  %v1223_v29 = vld [vmem:[%s1898_s23 + $0x78] sm:$0xff] }
 0x46b   : > { %v1046_v1 = vmul.f32 %v1545_v54, %v1032_v55  ;;  %1660 = vmatpush3.bf16.msra.mxu0 %v1657_v44  ;;  %v1669_v28 = vpack.c.bf16 %v1223_v29, %v1222_v36 }
 0x46c   : > { %v1729_v59 = vpop.eup %1728  ;;  %v1045_v63 = vmul.f32 %v1545_v54, %v1031_v58  ;;  %1662 = vmatprep.subr.bf16.mxu0 %v1661_v49 }
 0x46d   : > { %v1731_v0 = vpop.eup %1730  ;;  %v1034_v3 = vmul.f32 %v1729_v59, %v2145_v31  ;;  %v1060_v13 = vadd.f32 %v1546_v19, %v1046_v1 }
 0x46e   : > { %v1033_v46 = vmul.f32 %v1731_v0, %v2152_v41  ;;  %v1059_v2 = vadd.f32 %v1546_v19, %v1045_v63 }
 0x46f   : > { %v1048_v14 = vmul.f32 %v1545_v54, %v1034_v3  ;;  %1664 = vmatpush3.bf16.msra.mxu0 %v1661_v49 }
 0x470   : > { %v1733_v5 = vpop.eup %1732  ;;  %v1047_v23 = vmul.f32 %v1545_v54, %v1033_v46  ;;  %v1085_v20 = vcombine.low %v1058_v6, %v1059_v2  ;;  %1666 = vmatprep.subr.bf16.mxu0 %v1665_v53 }
 0x471   : > { %v1735_v30 = vpop.eup %1734  ;;  %v1036_v12 = vmul.f32 %v1733_v5, %v2155_v42  ;;  %v1062_v42 = vadd.f32 %v1546_v19, %v1048_v14 }
 0x472   : > { %v1035_v16 = vmul.f32 %v1735_v30, %v2163_v50  ;;  %v1061_v11 = vadd.f32 %v1546_v19, %v1047_v23  ;;  %v1093_v24 = vrot.slane %v1085_v20, %v2070_v47  ;;  %v1550_v30 = vld [vmem:[%s547_s20] ss:$0 sm:$0xff] }
 0x473   : > { %v1050_v17 = vmul.f32 %v1545_v54, %v1036_v12  ;;  %1668 = vmatpush3.bf16.msra.mxu0 %v1665_v53 }
 0x474   : > { %v1737_v15 = vpop.eup %1736  ;;  %v1049_v18 = vmul.f32 %v1545_v54, %v1035_v16  ;;  %v1086_v22 = vcombine.low %v1060_v13, %v1061_v11  ;;  %1670 = vmatprep.subr.bf16.mxu0 %v1669_v28 }
 0x475   : > { %v1037_v41 = vmul.f32 %v1737_v15, %v2172_v37  ;;  %v1064_v21 = vadd.f32 %v1546_v19, %v1050_v17 }
 0x476   : > { %v1063_v31 = vadd.f32 %v1546_v19, %v1049_v18  ;;  %v1100_v57 = vrot.slane %v1086_v22, %v2070_v47 }
 0x477   : > { %v1051_v25 = vmul.f32 %v1545_v54, %v1037_v41  ;;  %1672 = vmatpush3.bf16.msra.mxu0 %v1669_v28  ;;  %v1547_v54 = vld [vmem:[%s539_s30] ss:$0 sm:$0xff] }
 0x478   : > { %v1101_v50 = vcombine.low %v1093_v24, %v1100_v57  ;;  %v1102_v27 = vcombine.low %v1062_v42, %v1063_v31 }
 0x479   : > { %v1065_v26 = vadd.f32 %v1546_v19, %v1051_v25 }
 0x47a   : > { %1595 = vmatprep.mubr.msk.f32.mxu1 %vm772_vm3, %v1101_v50  ;;  %v1110_v37 = vrot.slane %v1102_v27, %v2070_v47 }
 0x47b   : > { %v1103_v32 = vcombine.low %v1064_v21, %v1065_v26 }
 0x47d   : > { %v1117_v33 = vrot.slane %v1103_v32, %v2070_v47 }
 0x47f   : > { %v1118_v34 = vcombine.low %v1110_v37, %v1117_v33 }
 0x481   : > { %1596 = vmatmul.mubr.msk.f32.vlgmr.msra.gmra.mrb[2].mxu1 %vm772_vm3, %v1118_v34 }
 0x554   : > { %v1597_v55 = vpop.f32.mrb[2].mxu1 }
 0x555   : > { %v1195_v58 = vadd.f32 %v1597_v55, %v1547_v54  ;;  %v1189_v59 = vpop.f32.mrb[3].mxu1 }
 0x556   : > { %v1190_v60 = vadd.f32 %v1547_v54, %v1189_v59 }
 0x557   : > { %v1201_v63 = vmul.f32 0.70710677, %v1195_v58  ;;  %v1199_v5 = vmul.f32 0.5, %v1195_v58 }
 0x558   : > { %v1200_v0 = vmul.f32 0.70710677, %v1190_v60  ;;  %v1198_v2 = vmul.f32 0.5, %v1190_v60 }
 0x559   : > { %1738 = verf.f32 %v1201_v63 }
 0x55a   : > { %1740 = verf.f32 %v1200_v0 }
 0x563   : > { %v1739_v19 = vpop.eup %1738 }
 0x564   : > { %v1741_v1 = vpop.eup %1740  ;;  %v1205_v46 = vadd.f32 1.0, %v1739_v19 }
 0x565   : > { %v1204_v3 = vadd.f32 1.0, %v1741_v1 }
 0x566   : > { %v1207_v6 = vmul.f32 %v1205_v46, %v1199_v5 }
 0x567   : > { %v1206_v23 = vmul.f32 %v1204_v3, %v1198_v2 }
 0x569   : > { %1630 = vmatprep.mubr.f32.mxu0 %v1206_v23 }
 0x56a   : > { %1631 = vmatmul.mubr.f32.vlgmr.msra.gmra.mrb[0].mxu0 %v1207_v6 }
 0x63d   : > { %v1632_v12 = vpop.f32.mrb[0].mxu0 }
 0x63e   : > { %v1303_v16 = vadd.f32 %v1632_v12, %v1550_v30  ;;  %v1297_v13 = vpop.f32.mrb[1].mxu0 }
 0x63f   : > { %v1298_v11 = vadd.f32 %v1550_v30, %v1297_v13 }
 0x640   : > { %v1325_v20 = vcombine.high %v1303_v16, %v1303_v16  ;;  %v1332_v14 = vrot.slane %v1303_v16, %v2070_v47 }
 0x641   : > { %v1308_v15 = vcombine.high %v1298_v11, %v1298_v11  ;;  %v1315_v18 = vrot.slane %v1298_v11, %v2070_v47 }
 0x642   : > { %v1339_v22 = vrot.slane %v1325_v20, %v2070_v47  ;;  %v1340_v17 = vcombine.high %v1332_v14, %v1332_v14  ;;  %v1354_v41 = vadd.f32 %v1332_v14, %v2103_v9 }
 0x643   : > { %v1322_v31 = vrot.slane %v1308_v15, %v2070_v47  ;;  %v1323_v24 = vcombine.high %v1315_v18, %v1315_v18  ;;  %v1350_v57 = vadd.f32 %v1315_v18, %v2091_v62 }
 0x644   : > { %v1341_v42 = vcombine.high %v1339_v22, %v1339_v22  ;;  %v1355_v25 = vadd.f32 %v1340_v17, %v2121_v10  ;;  %v1356_v50 = vadd.f32 %v1339_v22, %v2113_v7  ;;  %1362 = vst.msk [vmem:[%s2297_s11 + $0x8] sm:$0x3] %vm583_vm1, %v1354_v41 }
 0x645   : > { %v1324_v21 = vcombine.high %v1322_v31, %v1322_v31  ;;  %v1351_v26 = vadd.f32 %v1323_v24, %v2100_v4  ;;  %v1352_v9 = vadd.f32 %v1322_v31, %v2088_v61  ;;  %1358 = vst.msk [vmem:[%s2297_s11] sm:$0x3] %vm583_vm1, %v1350_v57 }
 0x646   : > { %v1357_v47 = vadd.f32 %v1341_v42, %v2127_v56  ;;  %1363 = vst.msk [vmem:[%s2297_s11 + $0xa] sm:$0x3] %vm583_vm1, %v1355_v25  ;;  %1364 = vst.msk [vmem:[%s2297_s11 + $0xc] sm:$0x3] %vm583_vm1, %v1356_v50 }
 0x647   : > { %v1353_v62 = vadd.f32 %v1324_v21, %v2106_v8  ;;  %1359 = vst.msk [vmem:[%s2297_s11 + $0x2] sm:$0x3] %vm583_vm1, %v1351_v26  ;;  %1360 = vst.msk [vmem:[%s2297_s11 + $0x4] sm:$0x3] %vm583_vm1, %v1352_v9 }
 0x648   : > { %1365 = vst.msk [vmem:[%s2297_s11 + $0xe] sm:$0x3] %vm583_vm1, %v1357_v47 }
 0x649   : > { %1361 = vst.msk [vmem:[%s2297_s11 + $0x6] sm:$0x3] %vm583_vm1, %v1353_v62 }
 0x64a PF: > { %s2308_s25 = sld [smem:[#allocation3_spill]]  ;;  %s2309_s17 = sld [smem:[#allocation2_spill]] }
 0x64b   : > { %s2310_s18 = sld [smem:[#allocation4_spill]] }
 0x650   : > { %s21_s19 = sadd.s32 1, %s2308_s25  }
 0x651   : > { %p18_p6 = scmp.ge.s32.totalorder %s21_s19, 4  }
 0x653   :  { %20 = sbr.rel (!%p18_p6) target bundleno = 2 (0x2), region = 128 }

</bundles_post_ra>
